<compile_context>
chip_gen: v5e
topology: v5e:2x2
jax: 0.10.0
libtpu: 0.0.40
codegen_flags: <defaults>
</compile_context>

<pallas_src>
import jax
import jax.numpy as jnp
from jax import lax
from jax.experimental import pallas as pl
from jax.experimental.pallas import tpu as pltpu


def _cdiv(a, b):
    return -(-a // b)


# ----------------------- fused query + scores kernel ------------------------

def rtcomplex_fused_scores_kernel(lhs_ref, rel_ref, time_ref, right_ref,
                                  scores_ref):
    # Recompute the (B, 2R) query per entity tile: pure VPU work that hides
    # under the DMA/MXU-bound streaming loop (keeps the entity axis parallel).
    rp = lhs_ref.shape[1] // 2
    lhs0, lhs1 = lhs_ref[:, :rp], lhs_ref[:, rp:]
    rel0, rel1 = rel_ref[:, :rp], rel_ref[:, rp:]
    t0, t1 = time_ref[:, :rp], time_ref[:, rp:]

    # full_rel = rel * time (complex product)
    fr0 = rel0 * t0 - rel1 * t1
    fr1 = rel1 * t0 + rel0 * t1

    # q = lhs * full_rel (complex product), packed [real | imag], f32
    q = jnp.concatenate([lhs0 * fr0 - lhs1 * fr1,
                         lhs1 * fr0 + lhs0 * fr1], axis=1)

    # bf16-streamed table -> bf16 MXU operands with f32 accumulation.
    # (Casting q to bf16 compounds a little precision loss; tolerance is
    # documented/checked in __main__.  The f32 table path is exact.)
    q = q.astype(right_ref.dtype)

    # Natural (tile_n, 2R) layout contracted on dim 1 (i.e. q @ right.T) --
    # same pattern as flash-attention's 'bqd,bkd->bqk'; Mosaic lowers it
    # without an explicit XLU transpose of the multi-MiB entity tile.
    scores_ref[...] = lax.dot_general(
        q, right_ref[...],
        dimension_numbers=(((1,), (1,)), ((), ())),
        preferred_element_type=jnp.float32)


# ------------------------------ small helpers -------------------------------

def _pad_half_split(x, rank, rank_pad):
    """(.., 2*rank) [real|imag] -> (.., 2*rank_pad) with zero pad in each half."""
    if rank_pad == rank:
        return x
    pad = rank_pad - rank
    z = jnp.zeros((x.shape[0], pad), x.dtype)
    return jnp.concatenate([x[:, :rank], z, x[:, rank:], z], axis=1)


def prepare_entity_table(emb, rank, *, dtype=jnp.bfloat16):
    """Persistent streaming copy of the entity table.

    Each [real|imag] half is zero-padded so 2*rank_pad is a multiple of 128
    (lane-aligned splits, dense VMEM tiles, dense MXU contraction) and the
    table is (optionally) downcast to bf16, halving the dominant HBM stream.
    Padded columns are zero, so scores are unchanged.
    """
    rank_pad = _cdiv(rank, 64) * 64
    return _pad_half_split(emb, rank, rank_pad).astype(dtype)


def _regularizers(lhs, rel, time, rhs, rank):
    """sqrt regularizer terms on the un-padded gathered embeddings (plain JAX)."""
    lhs0, lhs1 = lhs[:, :rank], lhs[:, rank:]
    rel0, rel1 = rel[:, :rank], rel[:, rank:]
    rhs0, rhs1 = rhs[:, :rank], rhs[:, rank:]
    t0, t1 = time[:, :rank], time[:, rank:]
    fr0 = rel0 * t0 - rel1 * t1
    fr1 = rel1 * t0 + rel0 * t1
    return (jnp.sqrt(lhs0 * lhs0 + lhs1 * lhs1),
            jnp.sqrt(fr0 * fr0 + fr1 * fr1),
            jnp.sqrt(rhs0 * rhs0 + rhs1 * rhs1))


def _vmem_budget_bytes():
    """Generation-aware VMEM request: physical capacity minus reserve,
    capped at 100 MiB (v5e/v6e have 128 MiB physical; v7x only 64 MiB)."""
    cap = 64 << 20
    try:
        cap = int(pltpu.get_tpu_info().vmem_capacity_bytes)
    except Exception:
        pass
    return int(max(min(cap - (8 << 20), 100 << 20), 24 << 20))


def _choose_tile_n(n_entities, two_r, batch, table_itemsize, budget):
    """Largest 128-multiple entity tile that keeps double/triple buffering +
    output tiles + resident query operands inside the VMEM budget."""
    resident = 3 * batch * two_r * 4 + (2 << 20)          # lhs/rel/time + headroom
    avail = max(budget - resident, 1 << 20)
    per_row2 = 2 * two_r * table_itemsize + 2 * batch * 4  # 2 entity + 2 out bufs
    per_row3 = 3 * two_r * table_itemsize + 2 * batch * 4  # 3 entity + 2 out bufs
    tile3 = (avail // per_row3) // 128 * 128
    tile2 = (avail // per_row2) // 128 * 128
    tile_n = tile3 if tile3 >= 512 else max(tile2, 128)
    tile_n = max(min(tile_n, 4096), 128)
    if tile_n >= n_entities:
        return n_entities                                  # single full tile
    # v7x megacore: keep grid_n even when it is small so both TCs get equal work
    grid_n = _cdiv(n_entities, tile_n)
    if grid_n % 2 == 1 and grid_n <= 7:
        alt = _cdiv(_cdiv(n_entities, grid_n + 1), 128) * 128
        if 128 <= alt < tile_n:
            tile_n = alt
    return tile_n


def _entity_buffer_count(n_entities, tile_n, two_r, batch, table_itemsize, budget):
    grid_n = _cdiv(n_entities, tile_n)
    resident = 3 * batch * two_r * 4 + (2 << 20)
    need3 = 3 * tile_n * two_r * table_itemsize + 2 * batch * tile_n * 4 + resident
    return 3 if (grid_n >= 3 and need3 <= budget) else 2


# --------------------------------- wrapper ----------------------------------

def rtcomplex_forward_pallas(lhs, rel, time, rhs, right, *, rank, tile_n=None):
    """RTComplEx.forward hot path (post-gather).

    lhs/rel/time/rhs: (B, 2*rank) f32 gathered embeddings (un-padded).
    right:            (N, 2*rank_pad) entity table (rank_pad >= rank, each half
                      zero-padded), f32 for exact numerics or a persistent bf16
                      copy (default production path) to halve HBM traffic.
    Returns (scores (B, N) f32, (reg_lhs, reg_fullrel, reg_rhs), None, None),
    matching the PyTorch forward().
    """
    B, two_r_in = lhs.shape
    assert two_r_in == 2 * rank
    N, two_r = right.shape
    rank_pad = two_r // 2
    assert rank_pad >= rank

    # Regularizers: tiny B x R sqrt work, plain JAX (exact module numerics).
    regs = _regularizers(lhs, rel, time, rhs, rank)

    # Pad the small per-call operands to match the (persistently padded) table.
    lhs_p = _pad_half_split(lhs, rank, rank_pad)
    rel_p = _pad_half_split(rel, rank, rank_pad)
    time_p = _pad_half_split(time, rank, rank_pad)

    itemsize = jnp.dtype(right.dtype).itemsize
    budget = _vmem_budget_bytes()
    if tile_n is None:
        tile_n = _choose_tile_n(N, two_r, B, itemsize, budget)
    tile_n = min(tile_n, N)
    grid_n = _cdiv(N, tile_n)
    n_buf = _entity_buffer_count(N, tile_n, two_r, B, itemsize, budget)

    # Entity tile spec; triple-buffer the streamed table when the budget allows.
    entity_spec = pl.BlockSpec((tile_n, two_r), lambda j: (j, 0))
    if n_buf == 3 and hasattr(pl, "Buffered"):
        try:
            entity_spec = pl.BlockSpec((tile_n, two_r), lambda j: (j, 0),
                                       pipeline_mode=pl.Buffered(3))
        except TypeError:
            pass  # older BlockSpec without pipeline_mode: default double-buffering

    cost = pl.CostEstimate(
        flops=2 * B * N * two_r,
        transcendentals=0,
        bytes_accessed=N * two_r * itemsize + B * N * 4 + 3 * B * two_r * 4)

    scores = pl.pallas_call(
        rtcomplex_fused_scores_kernel,
        out_shape=jax.ShapeDtypeStruct((B, N), jnp.float32),
        grid=(grid_n,),
        in_specs=[
            pl.BlockSpec((B, two_r), lambda j: (0, 0)),   # lhs  (resident)
            pl.BlockSpec((B, two_r), lambda j: (0, 0)),   # rel  (resident)
            pl.BlockSpec((B, two_r), lambda j: (0, 0)),   # time (resident)
            entity_spec,                                   # entity tile (streamed)
        ],
        out_specs=pl.BlockSpec((B, tile_n), lambda j: (0, j)),
        compiler_params=pltpu.CompilerParams(
            # independent entity tiles -> shard over the 2 TCs on v7x
            dimension_semantics=("parallel",),
            vmem_limit_bytes=budget),
        cost_estimate=cost,
    )(lhs_p, rel_p, time_p, right)

    # TODO(synk): optional int8 entity table (per-row scales dequantized onto the
    # f32 scores tile) would further halve HBM traffic on v5e/v6e; v7x's MXU has
    # no int support, so an fp8 table would be needed there instead.
    return scores, regs, None, None


# ------------------------- GRU time embedding (glue) ------------------------

def gru_time_regularize(params, ntimestamps, rnn_size):
    """Matches nn.GRU(rnn_size, rnn_size) over rnn_input = zeros(T,1,H), h0,
    followed by post_rnn Linear(H, 2*rank). Returns (T, 2*rank)."""
    w_ih, w_hh, b_ih, b_hh = (params["w_ih"], params["w_hh"],
                              params["b_ih"], params["b_hh"])
    h0 = params["h0"][0, 0]  # (H,)
    H = rnn_size

    # input is identically zero -> W_ih @ x == 0; keep the term for fidelity
    x_t = jnp.zeros((H,), jnp.float32)
    gi = w_ih @ x_t + b_ih  # (3H,), constant across steps

    def step(h, _):
        gh = w_hh @ h + b_hh
        r = jax.nn.sigmoid(gi[:H] + gh[:H])
        z = jax.nn.sigmoid(gi[H:2 * H] + gh[H:2 * H])
        n = jnp.tanh(gi[2 * H:] + r * gh[2 * H:])
        h_new = (1.0 - z) * n + z * h
        return h_new, h_new

    _, outputs = lax.scan(step, h0, None, length=ntimestamps)  # (T, H)
    time_emb = outputs @ params["post_w"].T + params["post_b"]  # (T, 2*rank)
    return time_emb


# --------------------------- pure-JAX reference -----------------------------

def reference_forward(emb0, emb1, time_emb, x, rank):
    lhs = emb0[x[:, 0]]
    rel = emb1[x[:, 1]]
    rhs = emb0[x[:, 2]]
    time = time_emb[x[:, 3]]
    lhs0, lhs1 = lhs[:, :rank], lhs[:, rank:]
    rel0, rel1 = rel[:, :rank], rel[:, rank:]
    rhs0, rhs1 = rhs[:, :rank], rhs[:, rank:]
    t0, t1 = time[:, :rank], time[:, rank:]
    right0, right1 = emb0[:, :rank], emb0[:, rank:]
    fr0 = rel0 * t0 - rel1 * t1
    fr1 = rel1 * t0 + rel0 * t1
    scores = ((lhs0 * fr0 - lhs1 * fr1) @ right0.T
              + (lhs1 * fr0 + lhs0 * fr1) @ right1.T)
    regs = (jnp.sqrt(lhs0 ** 2 + lhs1 ** 2),
            jnp.sqrt(fr0 ** 2 + fr1 ** 2),
            jnp.sqrt(rhs0 ** 2 + rhs1 ** 2))
    return scores, regs


# ----------------------------------- main ------------------------------------

if __name__ == "__main__":
    # sizes = (n_entities, n_relations, n_entities, n_timestamps)
    # n_entities deliberately NOT a multiple of every tile_n we try, to
    # exercise the cdiv grid + partial last entity tile.
    sizes = (384, 16, 384, 32)
    rank = 32
    rnn_size = 10
    init_size = 0.01
    batch = 8          # multiple of 8 -> sublane-aligned (B, tile_n) f32 output

    key = jax.random.PRNGKey(0)
    keys = jax.random.split(key, 10)

    # Embedding tables (nn.Embedding default: N(0,1), then *= init_size)
    emb0 = jax.random.normal(keys[0], (sizes[0], 2 * rank), jnp.float32) * init_size
    emb1 = jax.random.normal(keys[1], (sizes[1], 2 * rank), jnp.float32) * init_size

    # GRU + post_rnn parameters (deterministic synthetic init)
    bound = 1.0 / jnp.sqrt(rnn_size)
    gru_params = {
        "w_ih": jax.random.uniform(keys[2], (3 * rnn_size, rnn_size),
                                   jnp.float32, -bound, bound),
        "w_hh": jax.random.uniform(keys[3], (3 * rnn_size, rnn_size),
                                   jnp.float32, -bound, bound),
        "b_ih": jax.random.uniform(keys[4], (3 * rnn_size,),
                                   jnp.float32, -bound, bound),
        "b_hh": jax.random.uniform(keys[5], (3 * rnn_size,),
                                   jnp.float32, -bound, bound),
        "post_w": jax.random.uniform(keys[6], (2 * rank, rnn_size),
                                     jnp.float32, -bound, bound),
        "post_b": jax.random.uniform(keys[7], (2 * rank,),
                                     jnp.float32, -bound, bound),
        "h0": jax.random.normal(keys[8], (1, 1, rnn_size), jnp.float32),
    }

    # Query quadruples (lhs, rel, rhs, timestamp)
    x = jnp.stack([
        jax.random.randint(jax.random.fold_in(keys[9], 0), (batch,), 0, sizes[0]),
        jax.random.randint(jax.random.fold_in(keys[9], 1), (batch,), 0, sizes[1]),
        jax.random.randint(jax.random.fold_in(keys[9], 2), (batch,), 0, sizes[0]),
        jax.random.randint(jax.random.fold_in(keys[9], 3), (batch,), 0, sizes[3]),
    ], axis=1)

    # Glue: GRU time embeddings + embedding gathers (sequential / sparse: JAX)
    time_emb = gru_time_regularize(gru_params, sizes[3], rnn_size)  # (T, 2R)
    lhs_e = emb0[x[:, 0]]
    rel_e = emb1[x[:, 1]]
    rhs_e = emb0[x[:, 2]]
    time_e = time_emb[x[:, 3]]

    ref_scores, (r_lhs, r_rel, r_rhs) = reference_forward(emb0, emb1, time_emb, x, rank)

    # ---- (1) exact f32 path, un-padded table, tile_n=256 -> grid of 2 tiles,
    # ----     second tile partial (384 % 256 != 0). ----
    scores, (reg_lhs, reg_rel, reg_rhs), _, _ = rtcomplex_forward_pallas(
        lhs_e, rel_e, time_e, rhs_e, emb0, rank=rank, tile_n=256)
    jax.block_until_ready((scores, reg_lhs, reg_rel, reg_rhs))
    assert not bool(jnp.any(jnp.isnan(scores) | jnp.isinf(scores)))
    assert jnp.allclose(scores, ref_scores, atol=1e-5, rtol=1e-5)
    assert jnp.allclose(reg_lhs, r_lhs, atol=1e-6, rtol=1e-5)
    assert jnp.allclose(reg_rel, r_rel, atol=1e-6, rtol=1e-5)
    assert jnp.allclose(reg_rhs, r_rhs, atol=1e-6, rtol=1e-5)

    # ---- (2) default production path: persistent rank-padded bf16 table
    # ----     (2R padded 64 -> 128), tile_n=128 -> grid of 3 tiles so the
    # ----     Buffered(3) entity pipeline is exercised. ----
    right_bf16 = prepare_entity_table(emb0, rank, dtype=jnp.bfloat16)
    scores_bf16, _, _, _ = rtcomplex_forward_pallas(
        lhs_e, rel_e, time_e, rhs_e, right_bf16, rank=rank, tile_n=128)
    jax.block_until_ready(scores_bf16)
    assert not bool(jnp.any(jnp.isnan(scores_bf16) | jnp.isinf(scores_bf16)))
    # bf16 table + bf16-cast query: documented relaxed tolerance.
    assert jnp.allclose(scores_bf16, ref_scores, atol=1e-5, rtol=2e-2)

    # ---- (3) same bf16 table with budget-derived tile_n (auto path). ----
    scores_auto, _, _, _ = rtcomplex_forward_pallas(
        lhs_e, rel_e, time_e, rhs_e, right_bf16, rank=rank)
    jax.block_until_ready(scores_auto)
    assert jnp.allclose(scores_auto, ref_scores, atol=1e-5, rtol=2e-2)

    # forward() also returns (scores, (reg_lhs, reg_rel, reg_rhs), None, None)
    _out = (scores, (reg_lhs, reg_rel, reg_rhs), None, None)
    print("KERNEL_OK")
</pallas_src>

<mosaic_0001>
module attributes {stable_mosaic.version = 11 : i64} {
  func.func @rtcomplex_fused_scores_kernel(%arg0: i32, %arg1: memref<8x64xf32, #tpu.memory_space<vmem>>, %arg2: memref<8x64xf32, #tpu.memory_space<vmem>>, %arg3: memref<8x64xf32, #tpu.memory_space<vmem>>, %arg4: memref<256x64xf32, #tpu.memory_space<vmem>>, %arg5: memref<8x256xf32, #tpu.memory_space<vmem>>) attributes {dimension_semantics = [#tpu.dimension_semantics<parallel>], iteration_bounds = array<i64: 2>, scalar_prefetch = 0 : i64, scratch_operands = 0 : i64, tpu.core_type = #tpu.core_type<tc>, window_params = [{pipeline_mode = #tpu.pipeline_mode<synchronous>, transform_indices = @transform_0, window_bounds = array<i64: 8, 64>}, {pipeline_mode = #tpu.pipeline_mode<synchronous>, transform_indices = @transform_1, window_bounds = array<i64: 8, 64>}, {pipeline_mode = #tpu.pipeline_mode<synchronous>, transform_indices = @transform_2, window_bounds = array<i64: 8, 64>}, {transform_indices = @transform_3, window_bounds = array<i64: 256, 64>}, {transform_indices = @transform_4, window_bounds = array<i64: 8, 256>}]} {
    %c0 = arith.constant 0 : index
    %c0_0 = arith.constant 0 : index
    %0 = vector.load %arg1[%c0, %c0_0] : memref<8x64xf32, #tpu.memory_space<vmem>>, vector<8x32xf32>
    %c0_1 = arith.constant 0 : index
    %c32 = arith.constant 32 : index
    %1 = vector.load %arg1[%c0_1, %c32] : memref<8x64xf32, #tpu.memory_space<vmem>>, vector<8x32xf32>
    %c0_2 = arith.constant 0 : index
    %c0_3 = arith.constant 0 : index
    %2 = vector.load %arg2[%c0_2, %c0_3] : memref<8x64xf32, #tpu.memory_space<vmem>>, vector<8x32xf32>
    %c0_4 = arith.constant 0 : index
    %c32_5 = arith.constant 32 : index
    %3 = vector.load %arg2[%c0_4, %c32_5] : memref<8x64xf32, #tpu.memory_space<vmem>>, vector<8x32xf32>
    %c0_6 = arith.constant 0 : index
    %c0_7 = arith.constant 0 : index
    %4 = vector.load %arg3[%c0_6, %c0_7] : memref<8x64xf32, #tpu.memory_space<vmem>>, vector<8x32xf32>
    %c0_8 = arith.constant 0 : index
    %c32_9 = arith.constant 32 : index
    %5 = vector.load %arg3[%c0_8, %c32_9] : memref<8x64xf32, #tpu.memory_space<vmem>>, vector<8x32xf32>
    %6 = arith.mulf %2, %4 : vector<8x32xf32>
    %7 = arith.mulf %3, %5 : vector<8x32xf32>
    %8 = arith.subf %6, %7 : vector<8x32xf32>
    %9 = arith.mulf %3, %4 : vector<8x32xf32>
    %10 = arith.mulf %2, %5 : vector<8x32xf32>
    %11 = arith.addf %9, %10 : vector<8x32xf32>
    %12 = arith.mulf %0, %8 : vector<8x32xf32>
    %13 = arith.mulf %1, %11 : vector<8x32xf32>
    %14 = arith.subf %12, %13 : vector<8x32xf32>
    %15 = arith.mulf %1, %8 : vector<8x32xf32>
    %16 = arith.mulf %0, %11 : vector<8x32xf32>
    %17 = arith.addf %15, %16 : vector<8x32xf32>
    %18 = tpu.concatenate %14, %17 in 1 : vector<8x32xf32>, vector<8x32xf32> -> vector<8x64xf32>
    %c0_10 = arith.constant 0 : index
    %c0_11 = arith.constant 0 : index
    %19 = vector.load %arg4[%c0_10, %c0_11] : memref<256x64xf32, #tpu.memory_space<vmem>>, vector<256x64xf32>
    %cst = arith.constant dense<0.000000e+00> : vector<8x256xf32>
    %20 = tpu.matmul %18, %19, %cst {dimension_numbers = #tpu.dot_dimension_numbers<[1], [1], [0], [0], [0, 0, 1, 0], [], []>} : vector<8x64xf32>, vector<256x64xf32>, vector<8x256xf32> -> vector<8x256xf32>
    %c0_12 = arith.constant 0 : index
    %c0_13 = arith.constant 0 : index
    %21 = vector.load %arg5[%c0_12, %c0_13] : memref<8x256xf32, #tpu.memory_space<vmem>>, vector<8x256xf32>
    tpu.vector_store %arg5[%c0_12, %c0_13], %20 {strides = array<i32>} : memref<8x256xf32, #tpu.memory_space<vmem>>, vector<8x256xf32>,
    return
  }
  func.func @transform_0(%arg0: i32) -> (i32, i32) {
    %c0_i32 = arith.constant 0 : i32
    %c0_i32_0 = arith.constant 0 : i32
    %c0_i32_1 = arith.constant 0 : i32
    return %c0_i32, %c0_i32_0 : i32, i32
  }
  func.func @transform_1(%arg0: i32) -> (i32, i32) {
    %c0_i32 = arith.constant 0 : i32
    %c0_i32_0 = arith.constant 0 : i32
    %c0_i32_1 = arith.constant 0 : i32
    return %c0_i32, %c0_i32_0 : i32, i32
  }
  func.func @transform_2(%arg0: i32) -> (i32, i32) {
    %c0_i32 = arith.constant 0 : i32
    %c0_i32_0 = arith.constant 0 : i32
    %c0_i32_1 = arith.constant 0 : i32
    return %c0_i32, %c0_i32_0 : i32, i32
  }
  func.func @transform_3(%arg0: i32) -> (i32, i32) {
    %c0_i32 = arith.constant 0 : i32
    %c0_i32_0 = arith.constant 0 : i32
    return %arg0, %c0_i32 : i32, i32
  }
  func.func @transform_4(%arg0: i32) -> (i32, i32) {
    %c0_i32 = arith.constant 0 : i32
    %c0_i32_0 = arith.constant 0 : i32
    return %c0_i32, %arg0 : i32, i32
  }
}

</mosaic_0001>

<bundles_post_ra>
// kernel: tpu_custom_call.1
= control target key start
LH: loop header
LB: loop body
LE: loop exit
PB: predicated region body
PF: predicated region fallthrough
CT: control target
= control target key end

     0   :  { %9 = vsyncpa [#allocation3], 0  ;;  %s917_s0 = inlined_call_operand.vmem [shape: f32[8,64], index: 0, kind: input, shape index: {}]   ;;  %s918_s1 = inlined_call_operand.vmem [shape: f32[8,64], index: 1, kind: input, shape index: {}]   ;;  %s919_s2 = inlined_call_operand.vmem [shape: f32[8,64], index: 2, kind: input, shape index: {}]   ;;  %s920_s3 = inlined_call_operand.vmem [shape: f32[384,64], index: 3, kind: input, shape index: {}]   ;;  %s921_s4 = inlined_call_operand.hbm [shape: f32[8,384], index: 4, kind: output, shape index: {}]  }
   0x1   :  { %11 = vsyncpa [#allocation3 + $0x1], 0  ;;  %s721_s15 = smov 0   ;;  %s723_s16 = smov 0  }
   0x2   :  { %s725_s17 = smov 0   ;;  %s727_s18 = smov 0  }
   0x3 LB: > { %s742_s19 = sadd.s32 4294967295, %s691_s18   ;;  %s527_s20 = sadd.s32 4294967294, %s691_s18   ;;  %s691_s18 = sphi %s727_s18, %s928_s18   ;;  %s687_s17 = sphi %s725_s17, %s927_s17   ;;  %s683_s16 = sphi %s723_s16, %s926_s16   ;;  %s679_s15 = sphi %s721_s15, %s925_s15  }
   0x4   : > { %s746_s21 = sadd.s32 1, %s691_s18   ;;  %s113_s22 = sadd.s32 1, %s687_s17 }
   0x5   : > { %s110_s23 = ssub.s32 %s691_s18, %s746_s21  ;;  %p123_p0 = scmp.ne.s32.totalorder %s687_s17, %s683_s16 }
   0x6   : > { %p111_p1 = scmp.eq.s32.totalorder %s110_s23, 0  ;;  %p124_p2 = scmp.eq.s32.totalorder %s742_s19, 1 }
   0x7   : > { %p129_p3 = scmp.ne.s32.totalorder %s683_s16, %s679_s15  ;;  %p130_p4 = scmp.eq.s32.totalorder %s527_s20, 1 }
   0x8   : > { %s757_s24 = scalar_select %p111_p1, %s687_s17, %s113_s22  }
   0x9   : > { %p759_p5 = por %p124_p2, %p123_p0  ;;  %p763_p6 = por %p130_p4, %p129_p3 }
   0xa   : > { %p530_p7 = scmp.ge.s32.totalorder %s691_s18, 1  ;;  %p174_p8 = scmp.lt.s32.totalorder %s691_s18, 3 }
   0xc   : > { %p175_p9 = pnand %p530_p7, %p174_p8 }
   0xd   : > { %s693_s29 = smov (!%p175_p9), 96   ;;  %s694_s30 = smov (!%p175_p9), 32  }
   0xe   : > { %178 = sbr.rel (%p175_p9) target bundleno = 623 (0x26f), region = 36  ;;  %s532_s9 = sshll.u32 (!%p175_p9), %s742_s19, 5 }
   0xf   : > { %p209_p10 = scmp.lt.s32.totalorder (!%p175_p9), %s532_s9, 47  ;;  %s201_s14 = sand.u32 (!%p175_p9), 1, %s683_s16  }
  0x10   : > { %s531_s20 = sshll.u32 (!%p175_p9), %s201_s14, 4  ;;  %s865_s23 = scalar_lea.sflag (!%p175_p9), [#allocation3], %s201_s14 }
  0x11   : > { %s203_s22 = scalar_lea.vmem (!%p175_p9), [#allocation2], %s531_s20 }
  0x13   : > { %v225_v0 = vld [vmem:[%s919_s2] sm:$0xff]  ;;  %s930_s9 = smov (!%p209_p10, %s532_s9), 47  ;;  %vm302_vm0 = vcmask 523264   ;;  %vm268_vm1 = vcmask 261120   ;;  %s569_s27 = sshll.u32 (%p759_p5), %s742_s19, 1 }
  0x14   : > { %237 = vrot.lane.b32.xlu0 %v225_v0, %s693_s29  ;;  %v224_v1 = vld [vmem:[%s918_s1] sm:$0xff]  ;;  %s533_s10 = sshll.u32 %s930_s9, 3  ;;  %s453_s28 = ssub.s32 (%p759_p5), 3, %s569_s27 }
  0x15   : > { %v226_v4 = vmul.f32 %v225_v0, %v224_v1  ;;  %v780_v8 = vld [vmem:[%s917_s0] sm:$0xff]  ;;  %s789_s13 = scalar_lea.vmem %s920_s3, %s533_s10  ;;  %p454_p11 = scmp.lt.s32.totalorder (%p759_p5), %s453_s28, 2 }
  0x16   : > { %v285_v13 = vld [vmem:[%s789_s13 + $0x78] sm:$0xff]  ;;  %v284_v15 = vld [vmem:[%s789_s13 + $0x70] sm:$0xff]  ;;  %v283_v19 = vld [vmem:[%s789_s13 + $0x68] sm:$0xff] }
  0x17   : > { %v301_v14 = vld [vmem:[%s789_s13 + $0xf8] sm:$0xff]  ;;  %534 = vmatpush.xpose.msk.msra.mxu0 %vm302_vm0, %v285_v13  ;;  %v300_v16 = vld [vmem:[%s789_s13 + $0xf0] sm:$0xff]  ;;  %v299_v20 = vld [vmem:[%s789_s13 + $0xe8] sm:$0xff] }
  0x18   : > { %551 = vmatpush.xpose.msk.msra.mxu1 %vm302_vm0, %v301_v14  ;;  %v282_v21 = vld [vmem:[%s789_s13 + $0x60] sm:$0xff]  ;;  %v281_v23 = vld [vmem:[%s789_s13 + $0x58] sm:$0xff]  ;;  %v280_v25 = vld [vmem:[%s789_s13 + $0x50] sm:$0xff] }
  0x19   : > { %v298_v22 = vld [vmem:[%s789_s13 + $0xe0] sm:$0xff]  ;;  %v297_v24 = vld [vmem:[%s789_s13 + $0xd8] sm:$0xff]  ;;  %v296_v26 = vld [vmem:[%s789_s13 + $0xd0] sm:$0xff] }
  0x1a   : > { %v279_v27 = vld [vmem:[%s789_s13 + $0x48] sm:$0xff]  ;;  %v278_v29 = vld [vmem:[%s789_s13 + $0x40] sm:$0xff]  ;;  %v277_v31 = vld [vmem:[%s789_s13 + $0x38] sm:$0xff] }
  0x1b   : > { %535 = vmatpush.xpose.msk.msra.mxu0 %vm302_vm0, %v284_v15  ;;  %v295_v28 = vld [vmem:[%s789_s13 + $0xc8] sm:$0xff]  ;;  %v294_v30 = vld [vmem:[%s789_s13 + $0xc0] sm:$0xff]  ;;  %v293_v32 = vld [vmem:[%s789_s13 + $0xb8] sm:$0xff] }
  0x1c   : > { %233 = vrot.lane.b32.xlu0 %v225_v0, %s694_s30  ;;  %552 = vmatpush.xpose.msk.msra.mxu1 %vm302_vm0, %v300_v16  ;;  %v276_v33 = vld [vmem:[%s789_s13 + $0x30] sm:$0xff]  ;;  %v275_v35 = vld [vmem:[%s789_s13 + $0x28] sm:$0xff]  ;;  %v274_v37 = vld [vmem:[%s789_s13 + $0x20] sm:$0xff] }
  0x1d   : > { %v292_v34 = vld [vmem:[%s789_s13 + $0xb0] sm:$0xff]  ;;  %v291_v36 = vld [vmem:[%s789_s13 + $0xa8] sm:$0xff]  ;;  %v290_v38 = vld [vmem:[%s789_s13 + $0xa0] sm:$0xff] }
  0x1e   : > { %v273_v39 = vld [vmem:[%s789_s13 + $0x18] sm:$0xff]  ;;  %v272_v41 = vld [vmem:[%s789_s13 + $0x10] sm:$0xff]  ;;  %v271_v43 = vld [vmem:[%s789_s13 + $0x8] sm:$0xff] }
  0x1f   : > { %536 = vmatpush.xpose.msk.msra.mxu0 %vm302_vm0, %v283_v19  ;;  %v289_v40 = vld [vmem:[%s789_s13 + $0x98] sm:$0xff]  ;;  %v288_v42 = vld [vmem:[%s789_s13 + $0x90] sm:$0xff]  ;;  %v287_v44 = vld [vmem:[%s789_s13 + $0x88] sm:$0xff] }
  0x20   : > { %553 = vmatpush.xpose.msk.msra.mxu1 %vm302_vm0, %v299_v20  ;;  %v270_v45 = vld [vmem:[%s789_s13] sm:$0xff] }
  0x21   : > { %v286_v46 = vld [vmem:[%s789_s13 + $0x80] sm:$0xff] }
  0x23   : > { %537 = vmatpush.xpose.msk.msra.mxu0 %vm302_vm0, %v282_v21 }
  0x24   : > { %554 = vmatpush.xpose.msk.msra.mxu1 %vm302_vm0, %v298_v22 }
  0x27   : > { %538 = vmatpush.xpose.msk.msra.mxu0 %vm302_vm0, %v281_v23 }
  0x28   : > { %555 = vmatpush.xpose.msk.msra.mxu1 %vm302_vm0, %v297_v24 }
  0x2b   : > { %539 = vmatpush.xpose.msk.msra.mxu0 %vm302_vm0, %v280_v25 }
  0x2c   : > { %556 = vmatpush.xpose.msk.msra.mxu1 %vm302_vm0, %v296_v26 }
  0x2f   : > { %540 = vmatpush.xpose.msk.msra.mxu0 %vm302_vm0, %v279_v27 }
  0x30   : > { %557 = vmatpush.xpose.msk.msra.mxu1 %vm302_vm0, %v295_v28 }
  0x33   : > { %541 = vmatpush.xpose.msk.msra.mxu0 %vm302_vm0, %v278_v29 }
  0x34   : > { %558 = vmatpush.xpose.msk.msra.mxu1 %vm302_vm0, %v294_v30 }
  0x37   : > { %542 = vmatpush.xpose.msk.msra.mxu0 %vm302_vm0, %v277_v31 }
  0x38   : > { %559 = vmatpush.xpose.msk.msra.mxu1 %vm302_vm0, %v293_v32 }
  0x3b   : > { %543 = vmatpush.xpose.msk.msra.mxu0 %vm302_vm0, %v276_v33 }
  0x3c   : > { %560 = vmatpush.xpose.msk.msra.mxu1 %vm302_vm0, %v292_v34 }
  0x3f   : > { %544 = vmatpush.xpose.msk.msra.mxu0 %vm302_vm0, %v275_v35 }
  0x40   : > { %561 = vmatpush.xpose.msk.msra.mxu1 %vm302_vm0, %v291_v36 }
  0x43   : > { %545 = vmatpush.xpose.msk.msra.mxu0 %vm302_vm0, %v274_v37 }
  0x44   : > { %562 = vmatpush.xpose.msk.msra.mxu1 %vm302_vm0, %v290_v38 }
  0x47   : > { %546 = vmatpush.xpose.msk.msra.mxu0 %vm302_vm0, %v273_v39 }
  0x48   : > { %563 = vmatpush.xpose.msk.msra.mxu1 %vm302_vm0, %v289_v40 }
  0x4b   : > { %547 = vmatpush.xpose.msk.msra.mxu0 %vm302_vm0, %v272_v41 }
  0x4c   : > { %564 = vmatpush.xpose.msk.msra.mxu1 %vm302_vm0, %v288_v42 }
  0x4f   : > { %548 = vmatpush.xpose.msk.msra.mxu0 %vm302_vm0, %v271_v43 }
  0x50   : > { %565 = vmatpush.xpose.msk.msra.mxu1 %vm302_vm0, %v287_v44 }
  0x53   : > { %549 = vmatpush.xpose.msk.msra.mxu0 %vm302_vm0, %v270_v45 }
  0x54   : > { %566 = vmatpush.xpose.msk.msra.mxu1 %vm302_vm0, %v286_v46 }
  0x86   : > { %v238_v2 = vpop.permute.xlu0 %237 }
  0x87   : > { %v240_v3 = vmul.f32 %v238_v2, %v224_v1 }
  0x89   : > { %242 = vrot.lane.b32.xlu1 %v240_v3, %s694_s30 }
  0x8e   : > { %v234_v5 = vpop.permute.xlu0 %233 }
  0x8f   : > { %v236_v6 = vmul.f32 %v234_v5, %v224_v1 }
  0x91   : > { %228 = vrot.lane.b32.xlu1 %v226_v4, %s693_s29 }
  0xfb   : > { %v243_v7 = vpop.permute.xlu1 %242 }
  0xfc   : > { %v245_v9 = vadd.f32 %v243_v7, %v236_v6 }
  0xfe   : > { %v247_v10 = vmul.f32 %v245_v9, %v780_v8  ;;  %259 = vrot.lane.b32.xlu2 %v245_v9, %s693_s29 }
 0x100   : > { %249 = vrot.lane.b32.xlu0 %v247_v10, %s693_s29 }
 0x103   : > { %v229_v11 = vpop.permute.xlu1 %228 }
 0x104   : > { %v784_v12 = vsub.f32 %v226_v4, %v229_v11 }
 0x106   : > { %254 = vrot.lane.b32.xlu2 %v784_v12, %s694_s30  ;;  %v246_v48 = vmul.f32 %v784_v12, %v780_v8 }
 0x158   : > { %v260_v17 = vpop.permute.xlu2 %259 }
 0x159   : > { %v262_v18 = vmul.f32 %v260_v17, %v780_v8 }
 0x15b   : > { %264 = vrot.lane.b32.xlu1 %v262_v18, %s694_s30 }
 0x160   : > { %v255_v47 = vpop.permute.xlu2 %254 }
 0x161   : > { %v257_v49 = vmul.f32 %v255_v47, %v780_v8 }
 0x172   : > { %v250_v50 = vpop.permute.xlu0 %249 }
 0x173   : > { %v252_v52 = vsub.f32 %v246_v48, %v250_v50 }
 0x1cd   : > { %v265_v51 = vpop.permute.xlu1 %264 }
 0x1ce   : > { %v267_v53 = vadd.f32 %v265_v51, %v257_v49 }
 0x1d0   : > { %v269_v54 = vsel %vm268_vm1, %v252_v52, %v267_v53 }
 0x1d1   : > { %550 = vmatmul.msk.f32.vlgmr.msra.gmra.mxu0 %vm302_vm0, %v269_v54  ;;  %567 = vmatmul.msk.f32.vlgmr.msra.gmra.mxu1 %vm302_vm0, %v269_v54 }
 0x24c   : > { %451 = sbr.rel (!%p759_p5) target bundleno = 623 (0x26f), region = 40 }
 0x24e   : > { %v419_v55 = vpop.f32.mrf.mxu0  ;;  %v439_v56 = vpop.f32.mrf.mxu1 }
 0x24f   : > { %442 = vst [vmem:[%s203_s22] sm:$0xff] %v419_v55 }
 0x250   : > { %443 = vst [vmem:[%s203_s22 + $0x8] sm:$0xff] %v439_v56 }
 0x251   : > { %s932_s28 = smov (!%p454_p11, %s453_s28), 2 }
 0x252   : > { %s570_s29 = sshll.u32 %s932_s28, 3 }
 0x253   : > { %s457_s30 = ssub.s32 16, %s570_s29 }
 0x254   : > { %s458_s5 = sshll.u32 %s457_s30, 4 }
 0x255   : > { %459 = vsyncadd %s865_s23, %s458_s5  ;;  %p874_p12 = scmp.ne.s32.totalorder %s570_s29, 0  ;;  %s577_s25 = sshll.u32 %s742_s19, 4 }
 0x256   : > { %s462_s9 = scalar_lea.hbm %s921_s4, %s577_s25  ;;  %s574_s10 = sshll.u32 %s932_s28, 7 }
 0x257   : > { %s465_s11 = sshll.u32 %s203_s22, 4  ;;  %s467_s12 = sshll.u32 %s462_s9, 4  ;;  %s466_s11 = int_to_ptr.vmem [resolvable:$true] %s465_s11  ;;  %s468_s12 = int_to_ptr.hbm [resolvable:$true] %s467_s12 }
 0x258   : > { %s618_s13 = sshra.s32 %s466_s11, 4  ;;  %s620_s14 = sshrl.u32 %s574_s10, 4  ;;  %s619_s13 = int_to_ptr.vmem [resolvable:$true] %s618_s13 }
 0x259   : > { %s625_s20 = scalar_lea.vmem %s619_s13, %s620_s14  ;;  %s695_s27 = smov [#allocation2]  }
 0x25a   : > { %p626_p13 = scmp.ne.s32.totalorder %s619_s13, %s625_s20  ;;  %s629_s19 = scalar_lea.vmem %s695_s27, 32 }
 0x25b   : > { %p631_p2 = scmp.lt.s32.totalorder %s629_s19, %s625_s20 }
 0x25c   : > { %p627_p0 = pnand %p626_p13, %p874_p12 }
 0x25e   : > { %p628_p1 = pneg %p627_p0 }
 0x260   : > { %p633_p3 = pnand %p631_p2, %p628_p1 }
 0x262   : > { %636 = shalt.err (!%p633_p3)
}
 0x263   : > { %s637_s29 = sshra.s32 %s468_s12, 4  ;;  %s648_s25 = scalar_lea.hbm %s921_s4, 24  ;;  %s638_s29 = int_to_ptr.hbm [resolvable:$true] %s637_s29 }
 0x264   : > { %s644_s22 = scalar_lea.hbm %s638_s29, %s620_s14  ;;  %p649_p8 = scmp.lt.s32.totalorder %s638_s29, %s921_s4 }
 0x265   : > { %p645_p4 = scmp.ne.s32.totalorder %s638_s29, %s644_s22  ;;  %p650_p9 = scmp.lt.s32.totalorder %s648_s25, %s644_s22 }
 0x267   : > { %p646_p5 = pnand %p645_p4, %p874_p12  ;;  %p651_p10 = por %p650_p9, %p649_p8 }
 0x269   : > { %p647_p7 = pneg %p646_p5 }
 0x26b   : > { %p652_p11 = pnand %p651_p10, %p647_p7 }
 0x26d   : > { %655 = shalt.err (!%p652_p11)
}
 0x26e   : > { %470 = dma.vmem_to_hbm [thread:$0]  (%p874_p12), %s466_s11, %s574_s10, %s468_s12, %s865_s23  }
 0x26f PF: > { %p583_p13 = scmp.ge.s32.totalorder %s691_s18, 2  ;;  %s479_s9 = sand.u32 1, %s679_s15  }
 0x270   : > { %s480_s13 = scalar_lea.sflag [#allocation3], %s479_s9 }
 0x271   : > { %p580_p0 = pnand %p583_p13, %p763_p6 }
 0x273   : > { %p581_p1 = pneg %p580_p0 }
 0x275   : > { %674 = dma.done.wait (%p581_p1), %s480_s13, 256  }
 0x276   : > { %676 = vsyncadd (%p581_p1), %s480_s13, 4294967040  ;;  %p14_p2 = scmp.ge.s32.totalorder %s746_s21, 4   ;;  %s925_s15 = smov %s683_s16 }
 0x277   : > { %s926_s16 = smov %s687_s17  ;;  %s927_s17 = smov %s757_s24 }
 0x278   : > { %s928_s18 = smov %s746_s21  ;;  %16 = sbr.rel (!%p14_p2) target bundleno = 3 (0x3), region = 71 }
 0x27d   :  { %486 = vsyncpa [#allocation3], 1 }
 0x27e   :  { %488 = vsyncpa [#allocation3 + $0x1], 1 }

</bundles_post_ra>
